<compile_context>
chip_gen: v5e
topology: v5e:2x2
jax: 0.10.0
libtpu: 0.0.40
codegen_flags: <defaults>
</compile_context>

<pallas_src>
import functools

import numpy as np
import jax
import jax.numpy as jnp
from jax import lax
from jax.experimental import pallas as pl
from jax.experimental.pallas import tpu as pltpu


def _round_up(x, m):
    return ((x + m - 1) // m) * m


def _pick_tile(dim_p, cap, min_splits=1):
    """Largest multiple-of-128 divisor of dim_p that is <= cap and leaves at least
    `min_splits` grid steps.  dim_p must be a multiple of 128."""
    best = 128
    for t in range(128, dim_p + 1, 128):
        if t > cap or dim_p // t < min_splits:
            break
        if dim_p % t == 0:
            best = t
    return best


def _spike_kernel(x_ref, w_ref, s_ref, i_acc, *, threshold):
    """Accumulate i = x @ W^T over Din tiles; emit spikes on the last tile.

    grid = (n_out_tiles, n_in_tiles); axis 0 "parallel", axis 1 "arbitrary".
      x_ref: (B_p, TK)  f32          w_ref: (TO, TK)  native nn.Linear layout
      s_ref: (B_p, TO)  bf16 out     i_acc: (B_p, TO) f32 VMEM scratch
    """
    k = pl.program_id(1)

    @pl.when(k == 0)
    def _init():
        i_acc[...] = jnp.zeros_like(i_acc)

    # Contract the shared Din (last) dim of both operands: [B,K] x [O,K] -> [B,O].
    i_acc[...] += lax.dot_general(
        x_ref[...].astype(w_ref.dtype), w_ref[...],
        dimension_numbers=(((1,), (1,)), ((), ())),
        preferred_element_type=jnp.float32)

    @pl.when(k == pl.num_programs(1) - 1)
    def _emit():
        s_ref[...] = (i_acc[...] >= threshold).astype(s_ref.dtype)


def _dw_kernel(s_ref, trace_ref, dw_ref):
    """dw[o, i] = sum_b s[b, o] * trace[b, i]  (contraction over the batch axis).

    grid = (n_out_tiles, n_in_tiles); both axes "parallel".
      s_ref: (B_p, TO) bf16, trace_ref: (B_p, TK) f32, dw_ref: (TO, TK) dw_dtype.
    """
    dw_ref[...] = lax.dot_general(
        s_ref[...].astype(jnp.float32), trace_ref[...],
        dimension_numbers=(((0,), (0,)), ((), ())),
        preferred_element_type=jnp.float32).astype(dw_ref.dtype)


@functools.partial(
    jax.jit,
    static_argnames=("decay", "v_threshold", "block_out", "block_in", "dw_dtype"))
def stdp_forward(x, weight, trace_prev=None, *, decay=0.99, v_threshold=0.5,
                 block_out=1024, block_in=1024, dw_dtype=jnp.float32):
    """One STDP forward step. Returns (s, (dw,), new_trace).

    x:          [B, Din]     (any float dtype; math done in f32)
    weight:     [Dout, Din]  PyTorch nn.Linear layout, consumed as-is (f32 exact,
                             bf16 accepted for halved W bandwidth)
    trace_prev: [B, Din] or None (first step)
    """
    B, Din = x.shape
    Dout, Din_w = weight.shape
    assert Din == Din_w

    x = x.astype(jnp.float32)
    w_bytes = weight.dtype.itemsize
    dw_bytes = np.dtype(dw_dtype).itemsize

    # --- shape planning -----------------------------------------------------
    B_p = _round_up(B, 16)                 # dense bf16 (16,128) vregs for s
    Dout_p = _round_up(Dout, 128)
    Din_p = _round_up(Din, 128)
    # Tiles are multiple-of-128 divisors of the padded dims -> no padding beyond
    # the lane minimum, so post-kernel slices vanish when Dout/Din are already
    # multiples of 128.  Dout is the parallel axis: keep >= 2 steps for v7x.
    TO = _pick_tile(Dout_p, block_out, min_splits=2 if Dout_p >= 256 else 1)
    TK = _pick_tile(Din_p, block_in)
    n_to = Dout_p // TO
    n_tk = Din_p // TK

    pad_bd = (B_p != B) or (Din_p != Din)
    pad_w = (Dout_p != Dout) or (Din_p != Din)
    x_p = jnp.pad(x, ((0, B_p - B), (0, Din_p - Din))) if pad_bd else x
    w_p = (jnp.pad(weight, ((0, Dout_p - Dout), (0, Din_p - Din)))
           if pad_w else weight)

    # Trace update: tiny elementwise op, fused by XLA; returned un-padded.
    if trace_prev is None:
        new_trace = x                                   # decay * 0 + x
        trace_p = x_p
    else:
        new_trace = decay * trace_prev.astype(jnp.float32) + x
        trace_p = (jnp.pad(new_trace, ((0, B_p - B), (0, Din_p - Din)))
                   if pad_bd else new_trace)

    # --- kernel 1: spikes (tiled, pipelined, Din reduction in VMEM scratch) --
    vmem1 = (2 * TO * TK * w_bytes + 2 * B_p * TK * 4
             + 2 * B_p * TO * 2 + B_p * TO * 4 + (4 << 20))
    spike_kernel = functools.partial(_spike_kernel, threshold=v_threshold)
    s_p = pl.pallas_call(
        spike_kernel,
        out_shape=jax.ShapeDtypeStruct((B_p, Dout_p), jnp.bfloat16),
        grid_spec=pltpu.PrefetchScalarGridSpec(
            num_scalar_prefetch=0,
            grid=(n_to, n_tk),
            in_specs=[
                pl.BlockSpec((B_p, TK), lambda o, k: (0, k)),   # x
                pl.BlockSpec((TO, TK), lambda o, k: (o, k)),    # W (native layout)
            ],
            out_specs=pl.BlockSpec((B_p, TO), lambda o, k: (0, o)),
            scratch_shapes=[pltpu.VMEM((B_p, TO), jnp.float32)],
        ),
        compiler_params=pltpu.CompilerParams(
            dimension_semantics=("parallel", "arbitrary"),
            vmem_limit_bytes=min(max(vmem1, 32 << 20), 64 << 20)),
    )(x_p, w_p)

    # --- kernel 2: dw = s^T @ trace, fully parallel lane-dense (TO, TK) tiles --
    vmem2 = (2 * B_p * TO * 2 + 2 * B_p * TK * 4
             + 2 * TO * TK * dw_bytes + (4 << 20))
    dw_p = pl.pallas_call(
        _dw_kernel,
        out_shape=jax.ShapeDtypeStruct((Dout_p, Din_p), dw_dtype),
        grid_spec=pltpu.PrefetchScalarGridSpec(
            num_scalar_prefetch=0,
            grid=(n_to, n_tk),
            in_specs=[
                pl.BlockSpec((B_p, TO), lambda o, k: (0, o)),   # s (bf16)
                pl.BlockSpec((B_p, TK), lambda o, k: (0, k)),   # trace (f32)
            ],
            out_specs=pl.BlockSpec((TO, TK), lambda o, k: (o, k)),
        ),
        compiler_params=pltpu.CompilerParams(
            dimension_semantics=("parallel", "parallel"),
            vmem_limit_bytes=min(max(vmem2, 32 << 20), 64 << 20)),
    )(s_p, trace_p)

    # Return in the module's f32 contract; slices only exist if padding did.
    if B_p == B and Dout_p == Dout:
        s = s_p.astype(jnp.float32)
    else:
        s = s_p[:B, :Dout].astype(jnp.float32)
    dw = dw_p if not pad_w else dw_p[:Dout, :Din]
    return s, (dw,), new_trace


def _check_step(x, w, trace_prev, s, dw, trace, decay, thr):
    """Reference check in plain f32 JAX.  Spikes are allowed to differ only where
    the membrane potential is within float rounding of the threshold."""
    i_ref = jnp.dot(x, w.T, precision=lax.Precision.HIGHEST)
    s_ref = (i_ref >= thr).astype(jnp.float32)
    near_thr = jnp.abs(i_ref - thr) < 1e-4
    assert bool(jnp.all((s == s_ref) | near_thr)), "spike mismatch"
    trace_ref = x if trace_prev is None else decay * trace_prev + x
    assert jnp.allclose(trace, trace_ref, atol=1e-6), "trace mismatch"
    # dw kernel checked against the kernel's own spikes (independent of the
    # threshold boundary) and the reference trace.
    dw_ref = jnp.dot(s.T, trace_ref, precision=lax.Precision.HIGHEST)
    assert jnp.allclose(dw, dw_ref, atol=1e-4, rtol=1e-5), "dw mismatch"
    return trace_ref


if __name__ == "__main__":
    decay, thr = 0.99, 0.5
    key = jax.random.PRNGKey(0)
    k1, k2, kw, krest = jax.random.split(key, 4)

    # Config 1: non-multiples of (16, 128) exercise padding + slicing; 128-wide
    # tiles make both grids (2, 2) so tiling, the Din reduction and the parallel
    # Dout axis are all exercised.  Two steps exercise the stateful trace.
    B, Din, Dout = 4, 192, 160
    bound = 1.0 / (Din ** 0.5)
    w = jax.random.uniform(kw, (Dout, Din), jnp.float32, -bound, bound)
    x1 = (jax.random.uniform(k1, (B, Din)) > 0.5).astype(jnp.float32)
    x2 = (jax.random.uniform(k2, (B, Din)) > 0.5).astype(jnp.float32)

    s1, (dw1,), tr1 = stdp_forward(x1, w, None, decay=decay, v_threshold=thr,
                                   block_out=128, block_in=128)
    s2, (dw2,), tr2 = stdp_forward(x2, w, tr1, decay=decay, v_threshold=thr,
                                   block_out=128, block_in=128)
    jax.block_until_ready((s1, dw1, tr1, s2, dw2, tr2))

    tr1_ref = _check_step(x1, w, None, s1, dw1, tr1, decay, thr)
    _check_step(x2, w, tr1_ref, s2, dw2, tr2, decay, thr)

    # Config 2: already (16, 128)-aligned -> no padding, no post-kernel slices.
    Bb, Dinb, Doutb = 16, 256, 256
    kxb, kwb = jax.random.split(krest)
    boundb = 1.0 / (Dinb ** 0.5)
    wb = jax.random.uniform(kwb, (Doutb, Dinb), jnp.float32, -boundb, boundb)
    xb = (jax.random.uniform(kxb, (Bb, Dinb)) > 0.5).astype(jnp.float32)
    sb, (dwb,), trb = stdp_forward(xb, wb, None, decay=decay, v_threshold=thr,
                                   block_out=128, block_in=128)
    jax.block_until_ready((sb, dwb, trb))
    _check_step(xb, wb, None, sb, dwb, trb, decay, thr)

    print("KERNEL_OK")
</pallas_src>

<mosaic_0001>
module attributes {stable_mosaic.version = 11 : i64} {
  func.func @_spike_kernel(%arg0: i32, %arg1: i32, %arg2: memref<16x128xf32, #tpu.memory_space<vmem>>, %arg3: memref<128x128xf32, #tpu.memory_space<vmem>>, %arg4: memref<16x128xbf16, #tpu.memory_space<vmem>>, %arg5: memref<16x128xf32, #tpu.memory_space<vmem>>) attributes {dimension_semantics = [#tpu.dimension_semantics<parallel>, #tpu.dimension_semantics<arbitrary>], iteration_bounds = array<i64: 2, 2>, scalar_prefetch = 0 : i64, scratch_operands = 1 : i64, tpu.core_type = #tpu.core_type<tc>, window_params = [{transform_indices = @transform_0, window_bounds = array<i64: 16, 128>}, {transform_indices = @transform_1, window_bounds = array<i64: 128, 128>}, {transform_indices = @transform_2, window_bounds = array<i64: 16, 128>}]} {
    %c0_i32 = arith.constant 0 : i32
    %0 = arith.cmpi eq, %arg1, %c0_i32 : i32
    %1 = arith.extui %0 : i1 to i32
    %c0_i32_0 = arith.constant 0 : i32
    %2 = arith.cmpi ne, %1, %c0_i32_0 : i32
    scf.if %2 {
      %cst_9 = arith.constant 0.000000e+00 : f32
      %12 = vector.broadcast %cst_9 : f32 to vector<16x128xf32>
      %c0_10 = arith.constant 0 : index
      %c0_11 = arith.constant 0 : index
      %13 = vector.load %arg5[%c0_10, %c0_11] : memref<16x128xf32, #tpu.memory_space<vmem>>, vector<16x128xf32>
      tpu.vector_store %arg5[%c0_10, %c0_11], %12 {strides = array<i32>} : memref<16x128xf32, #tpu.memory_space<vmem>>, vector<16x128xf32>,
    } else {
    }
    %c0 = arith.constant 0 : index
    %c0_1 = arith.constant 0 : index
    %3 = vector.load %arg5[%c0, %c0_1] : memref<16x128xf32, #tpu.memory_space<vmem>>, vector<16x128xf32>
    %c0_2 = arith.constant 0 : index
    %c0_3 = arith.constant 0 : index
    %4 = vector.load %arg2[%c0_2, %c0_3] : memref<16x128xf32, #tpu.memory_space<vmem>>, vector<16x128xf32>
    %c0_4 = arith.constant 0 : index
    %c0_5 = arith.constant 0 : index
    %5 = vector.load %arg3[%c0_4, %c0_5] : memref<128x128xf32, #tpu.memory_space<vmem>>, vector<128x128xf32>
    %cst = arith.constant dense<0.000000e+00> : vector<16x128xf32>
    %6 = tpu.matmul %4, %5, %cst {dimension_numbers = #tpu.dot_dimension_numbers<[1], [1], [0], [0], [0, 0, 1, 0], [], []>} : vector<16x128xf32>, vector<128x128xf32>, vector<16x128xf32> -> vector<16x128xf32>
    %7 = arith.addf %3, %6 : vector<16x128xf32>
    %c0_6 = arith.constant 0 : index
    %c0_7 = arith.constant 0 : index
    %8 = vector.load %arg5[%c0_6, %c0_7] : memref<16x128xf32, #tpu.memory_space<vmem>>, vector<16x128xf32>
    tpu.vector_store %arg5[%c0_6, %c0_7], %7 {strides = array<i32>} : memref<16x128xf32, #tpu.memory_space<vmem>>, vector<16x128xf32>,
    %c1_i32 = arith.constant 1 : i32
    %9 = arith.cmpi eq, %arg1, %c1_i32 : i32
    %10 = arith.extui %9 : i1 to i32
    %c0_i32_8 = arith.constant 0 : i32
    %11 = arith.cmpi ne, %10, %c0_i32_8 : i32
    scf.if %11 {
      %c0_9 = arith.constant 0 : index
      %c0_10 = arith.constant 0 : index
      %12 = vector.load %arg5[%c0_9, %c0_10] : memref<16x128xf32, #tpu.memory_space<vmem>>, vector<16x128xf32>
      %cst_11 = arith.constant 5.000000e-01 : f32
      %13 = vector.broadcast %cst_11 : f32 to vector<16x128xf32>
      %14 = arith.cmpf oge, %12, %13 : vector<16x128xf32>
      %15 = arith.extui %14 : vector<16x128xi1> to vector<16x128xi32>
      %16 = arith.sitofp %15 : vector<16x128xi32> to vector<16x128xf32>
      %17 = arith.truncf %16 : vector<16x128xf32> to vector<16x128xbf16>
      %c0_12 = arith.constant 0 : index
      %c0_13 = arith.constant 0 : index
      %18 = vector.load %arg4[%c0_12, %c0_13] : memref<16x128xbf16, #tpu.memory_space<vmem>>, vector<16x128xbf16>
      tpu.vector_store %arg4[%c0_12, %c0_13], %17 {strides = array<i32>} : memref<16x128xbf16, #tpu.memory_space<vmem>>, vector<16x128xbf16>,
    } else {
    }
    return
  }
  func.func @transform_0(%arg0: i32, %arg1: i32) -> (i32, i32) {
    %c0_i32 = arith.constant 0 : i32
    %c0_i32_0 = arith.constant 0 : i32
    return %c0_i32, %arg1 : i32, i32
  }
  func.func @transform_1(%arg0: i32, %arg1: i32) -> (i32, i32) {
    %c0_i32 = arith.constant 0 : i32
    return %arg0, %arg1 : i32, i32
  }
  func.func @transform_2(%arg0: i32, %arg1: i32) -> (i32, i32) {
    %c0_i32 = arith.constant 0 : i32
    %c0_i32_0 = arith.constant 0 : i32
    return %c0_i32, %arg0 : i32, i32
  }
}

module attributes {stable_mosaic.version = 11 : i64} {
  func.func @_dw_kernel(%arg0: i32, %arg1: i32, %arg2: memref<16x128xbf16, #tpu.memory_space<vmem>>, %arg3: memref<16x128xf32, #tpu.memory_space<vmem>>, %arg4: memref<128x128xf32, #tpu.memory_space<vmem>>) attributes {dimension_semantics = [#tpu.dimension_semantics<parallel>, #tpu.dimension_semantics<parallel>], iteration_bounds = array<i64: 2, 2>, scalar_prefetch = 0 : i64, scratch_operands = 0 : i64, tpu.core_type = #tpu.core_type<tc>, window_params = [{transform_indices = @transform_0, window_bounds = array<i64: 16, 128>}, {transform_indices = @transform_1, window_bounds = array<i64: 16, 128>}, {transform_indices = @transform_2, window_bounds = array<i64: 128, 128>}]} {
    %c0 = arith.constant 0 : index
    %c0_0 = arith.constant 0 : index
    %0 = vector.load %arg2[%c0, %c0_0] : memref<16x128xbf16, #tpu.memory_space<vmem>>, vector<16x128xbf16>
    %1 = arith.extf %0 : vector<16x128xbf16> to vector<16x128xf32>
    %c0_1 = arith.constant 0 : index
    %c0_2 = arith.constant 0 : index
    %2 = vector.load %arg3[%c0_1, %c0_2] : memref<16x128xf32, #tpu.memory_space<vmem>>, vector<16x128xf32>
    %cst = arith.constant dense<0.000000e+00> : vector<128x128xf32>
    %3 = tpu.matmul %1, %2, %cst {dimension_numbers = #tpu.dot_dimension_numbers<[0], [0], [1], [1], [0, 1, 1, 1], [], []>} : vector<16x128xf32>, vector<16x128xf32>, vector<128x128xf32> -> vector<128x128xf32>
    %c0_3 = arith.constant 0 : index
    %c0_4 = arith.constant 0 : index
    %4 = vector.load %arg4[%c0_3, %c0_4] : memref<128x128xf32, #tpu.memory_space<vmem>>, vector<128x128xf32>
    tpu.vector_store %arg4[%c0_3, %c0_4], %3 {strides = array<i32>} : memref<128x128xf32, #tpu.memory_space<vmem>>, vector<128x128xf32>,
    return
  }
  func.func @transform_0(%arg0: i32, %arg1: i32) -> (i32, i32) {
    %c0_i32 = arith.constant 0 : i32
    %c0_i32_0 = arith.constant 0 : i32
    return %c0_i32, %arg0 : i32, i32
  }
  func.func @transform_1(%arg0: i32, %arg1: i32) -> (i32, i32) {
    %c0_i32 = arith.constant 0 : i32
    %c0_i32_0 = arith.constant 0 : i32
    return %c0_i32, %arg1 : i32, i32
  }
  func.func @transform_2(%arg0: i32, %arg1: i32) -> (i32, i32) {
    %c0_i32 = arith.constant 0 : i32
    return %arg0, %arg1 : i32, i32
  }
}

</mosaic_0001>

<bundles_post_ra>
// kernel: stdp_forward.2
= control target key start
LH: loop header
LB: loop body
LE: loop exit
PB: predicated region body
PF: predicated region fallthrough
CT: control target
= control target key end

     0   :  { %s758_s9 = smov 0   ;;  %s760_s10 = smov 0   ;;  %s966_s0 = inlined_call_operand.vmem [shape: f32[16,256], index: 0, kind: input, shape index: {}]   ;;  %s967_s1 = inlined_call_operand.vmem [shape: f32[256,256], index: 1, kind: input, shape index: {}]   ;;  %s968_s2 = inlined_call_operand.vmem [shape: bf16[16,256], index: 2, kind: output, shape index: {}]  }
   0x1   :  { %s762_s11 = smov 0   ;;  %s764_s12 = smov 0  }
   0x2   :  { %s766_s13 = smov 0   ;;  %s768_s14 = smov 0  }
   0x3   :  { %s770_s15 = smov 0   ;;  %s772_s16 = smov 0  }
   0x4   :  { %s774_s17 = smov 0   ;;  %s776_s18 = smov 0  }
   0x5   :  { %s778_s19 = smov 0  }
   0x6 LB: > { %s521_s20 = sadd.s32 4294967295, %s739_s19   ;;  %s21_s21 = sadd.s32 1, %s731_s17  ;;  %s739_s19 = sphi %s778_s19, %s12_s19   ;;  %s735_s18 = sphi %s776_s18, %s987_s18   ;;  %s731_s17 = sphi %s774_s17, %s986_s17   ;;  %s727_s16 = sphi %s772_s16, %s985_s16   ;;  %s723_s15 = sphi %s770_s15, %s984_s15   ;;  %s719_s14 = sphi %s768_s14, %s983_s14   ;;  %s715_s13 = sphi %s766_s13, %s982_s13   ;;  %s711_s12 = sphi %s764_s12, %s981_s12   ;;  %s707_s11 = sphi %s762_s11, %s980_s11   ;;  %s703_s10 = sphi %s760_s10, %s979_s10   ;;  %s699_s9 = sphi %s758_s9, %s978_s9  }
   0x7   : > { %p22_p0 = scmp.ge.s32.totalorder %s21_s21, 2  ;;  %s24_s22 = sadd.s32 1, %s735_s18 }
   0x8   : > { %s31_s23 = sadd.s32 1, %s719_s14  ;;  %p38_p1 = scmp.ne.s32.totalorder %s719_s14, %s715_s13 }
   0x9   : > { %s989_s21 = smov (%p22_p0, %s21_s21), 0  ;;  %s991_s22 = smov (!%p22_p0, %s24_s22), %s735_s18 }
   0xa   : > { %971 = sst [smem:[#allocation6_spill]] %s989_s21  ;;  %s28_s24 = ssub.s32 %s731_s17, %s989_s21 }
   0xb   : > { %p39_p2 = scmp.eq.s32.totalorder %s739_s19, 0  ;;  %p26_p3 = scmp.ge.s32.totalorder %s991_s22, 2 }
   0xc   : > { %p29_p4 = scmp.eq.s32.totalorder %s28_s24, 0  ;;  %s59_s26 = sadd.s32 1, %s711_s12 }
   0xd   : > { %p825_p5 = por %p39_p2, %p38_p1  ;;  %s993_s22 = smov (%p26_p3, %s991_s22), 0 }
   0xe   : > { %973 = sst [smem:[#allocation7_spill]] %s993_s22  ;;  %s54_s28 = ssub.s32 %s735_s18, %s993_s22 }
   0xf   : > { %s833_s27 = scalar_select %p29_p4, %s719_s14, %s31_s23  }
  0x10   : > { %p66_p6 = scmp.ne.s32.totalorder %s711_s12, %s707_s11  ;;  %s56_s29 = sor.u32 %s54_s28, %s28_s24 }
  0x11   : > { %p83_p7 = scmp.eq.s32.totalorder %s54_s28, 0  ;;  %p57_p8 = scmp.eq.s32.totalorder %s56_s29, 0 }
  0x12   : > { %p839_p9 = por %p66_p6, %p39_p2  ;;  %s85_s3 = sadd.s32 1, %s703_s10 }
  0x13   : > { %p95_p10 = scmp.ne.s32.totalorder %s703_s10, %s699_s9  ;;  %p96_p11 = scmp.eq.s32.totalorder %s521_s20, 3 }
  0x14   : > { %s847_s4 = scalar_select %p57_p8, %s711_s12, %s59_s26  }
  0x15   : > { %s850_s5 = scalar_select %p83_p7, %s703_s10, %s85_s3  }
  0x16   : > { %p852_p12 = por %p96_p11, %p95_p10  ;;  %p524_p13 = scmp.ge.s32.totalorder %s739_s19, 4 }
  0x18   : > { %118 = sbr.rel (%p524_p13) target bundleno = 57 (0x39), region = 16 }
  0x1d   : > { %121 = sbr.rel (!%p825_p5) target bundleno = 35 (0x23), region = 20  ;;  %s123_s7 = sand.u32 (%p825_p5), 1, %s719_s14  }
  0x1e   : > { %s526_s8 = sshll.u32 (%p825_p5), %s731_s17, 3  ;;  %s525_s23 = sshll.u32 (%p825_p5), %s123_s7, 4 }
  0x1f   : > { %s127_s28 = scalar_lea.vmem (%p825_p5), %s966_s0, %s526_s8  ;;  %s125_s20 = scalar_lea.vmem (%p825_p5), [#allocation3], %s525_s23 }
  0x20   : > { %v158_v0 = vld [vmem:[%s127_s28] sm:$0xff] (%p825_p5)  ;;  %v160_v1 = vld [vmem:[%s127_s28 + $0x10] sm:$0xff] (%p825_p5) }
  0x21   : > { %159 = vst [vmem:[%s125_s20] sm:$0xff] (%p825_p5), %v158_v0 }
  0x22   : > { %161 = vst [vmem:[%s125_s20 + $0x8] sm:$0xff] %v160_v1 }
  0x23 PF: > { %167 = sbr.rel (!%p839_p9) target bundleno = 57 (0x39), region = 58  ;;  %s169_s25 = sand.u32 (%p839_p9), 1, %s711_s12  }
  0x24   : > { %s543_s29 = sshll.u32 (%p839_p9), %s735_s18, 5  ;;  %s527_s3 = sshll.u32 (%p839_p9), %s169_s25, 7 }
  0x25   : > { %s174_s7 = sadd.s32 (%p839_p9), %s731_s17, %s543_s29  ;;  %s171_s30 = scalar_lea.vmem (%p839_p9), [#allocation4], %s527_s3 }
  0x26   : > { %s530_s22 = sshll.u32 (%p839_p9), %s174_s7, 3 }
  0x27   : > { %s872_s8 = scalar_lea.vmem (%p839_p9), %s967_s1, %s530_s22 }
  0x28   : > { %v235_v2 = vld [vmem:[%s872_s8] sm:$0xff]  ;;  %v237_v3 = vld [vmem:[%s872_s8 + $0x10] sm:$0xff] }
  0x29   : > { %v239_v4 = vld [vmem:[%s872_s8 + $0x20] sm:$0xff]  ;;  %236 = vst [vmem:[%s171_s30] sm:$0xff] %v235_v2  ;;  %v241_v5 = vld [vmem:[%s872_s8 + $0x30] sm:$0xff] }
  0x2a   : > { %238 = vst [vmem:[%s171_s30 + $0x8] sm:$0xff] %v237_v3  ;;  %v243_v6 = vld [vmem:[%s872_s8 + $0x40] sm:$0xff]  ;;  %v245_v7 = vld [vmem:[%s872_s8 + $0x50] sm:$0xff] }
  0x2b   : > { %240 = vst [vmem:[%s171_s30 + $0x10] sm:$0xff] %v239_v4  ;;  %v247_v8 = vld [vmem:[%s872_s8 + $0x60] sm:$0xff]  ;;  %v249_v9 = vld [vmem:[%s872_s8 + $0x70] sm:$0xff] }
  0x2c   : > { %242 = vst [vmem:[%s171_s30 + $0x18] sm:$0xff] %v241_v5  ;;  %v251_v10 = vld [vmem:[%s872_s8 + $0x80] sm:$0xff]  ;;  %v253_v11 = vld [vmem:[%s872_s8 + $0x90] sm:$0xff] }
  0x2d   : > { %244 = vst [vmem:[%s171_s30 + $0x20] sm:$0xff] %v243_v6  ;;  %v255_v12 = vld [vmem:[%s872_s8 + $0xa0] sm:$0xff]  ;;  %v257_v13 = vld [vmem:[%s872_s8 + $0xb0] sm:$0xff] }
  0x2e   : > { %246 = vst [vmem:[%s171_s30 + $0x28] sm:$0xff] %v245_v7  ;;  %v259_v14 = vld [vmem:[%s872_s8 + $0xc0] sm:$0xff]  ;;  %v261_v15 = vld [vmem:[%s872_s8 + $0xd0] sm:$0xff] }
  0x2f   : > { %248 = vst [vmem:[%s171_s30 + $0x30] sm:$0xff] %v247_v8  ;;  %v263_v16 = vld [vmem:[%s872_s8 + $0xe0] sm:$0xff]  ;;  %v265_v17 = vld [vmem:[%s872_s8 + $0xf0] sm:$0xff] }
  0x30   : > { %250 = vst [vmem:[%s171_s30 + $0x38] sm:$0xff] %v249_v9 }
  0x31   : > { %252 = vst [vmem:[%s171_s30 + $0x40] sm:$0xff] %v251_v10 }
  0x32   : > { %254 = vst [vmem:[%s171_s30 + $0x48] sm:$0xff] %v253_v11 }
  0x33   : > { %256 = vst [vmem:[%s171_s30 + $0x50] sm:$0xff] %v255_v12 }
  0x34   : > { %258 = vst [vmem:[%s171_s30 + $0x58] sm:$0xff] %v257_v13 }
  0x35   : > { %260 = vst [vmem:[%s171_s30 + $0x60] sm:$0xff] %v259_v14 }
  0x36   : > { %262 = vst [vmem:[%s171_s30 + $0x68] sm:$0xff] %v261_v15 }
  0x37   : > { %264 = vst [vmem:[%s171_s30 + $0x70] sm:$0xff] %v263_v16 }
  0x38   : > { %266 = vst [vmem:[%s171_s30 + $0x78] sm:$0xff] %v265_v17 }
  0x39 PF: > { %p531_p0 = scmp.ge.s32.totalorder %s739_s19, 1  ;;  %p271_p1 = scmp.lt.s32.totalorder %s739_s19, 5 }
  0x3b   : > { %p272_p2 = pnand %p531_p0, %p271_p1 }
  0x3c   : > { %s278_s21 = sand.u32 (!%p272_p2), 1, %s715_s13   ;;  %s285_s22 = sand.u32 (!%p272_p2), 1, %s707_s11  }
  0x3d   : > { %275 = sbr.rel (%p272_p2) target bundleno = 290 (0x122), region = 96  ;;  %s894_s23 = sshll.u32 (!%p272_p2), %s278_s21, 4 }
  0x3e   : > { %s533_s26 = sshll.u32 (!%p272_p2), %s285_s22, 7  ;;  %s306_s28 = sand.u32 (!%p272_p2), 1, %s699_s9  }
  0x3f   : > { %s534_s20 = sshll.u32 (!%p272_p2), %s306_s28, 3  ;;  %s280_s25 = scalar_lea.vmem (!%p272_p2), [#allocation3], %s894_s23 }
  0x40   : > { %s898_s29 = scalar_lea.vmem (!%p272_p2), [#allocation4], %s533_s26  ;;  %s900_s3 = scalar_lea.vmem (!%p272_p2), [#allocation5], %s534_s20 }
  0x41   : > { %p535_p3 = scmp.ne.s32.totalorder (!%p272_p2), %s723_s15, 0 }
  0x43   : > { %313 = sbr.rel (%p535_p3) target bundleno = 75 (0x4b), region = 108 }
  0x48   : > { %v741_v18 = vmov 0.0  }
  0x49   : > { %314 = vst [vmem:[#allocation2] sm:$0xff] %v741_v18 }
  0x4a   : > { %315 = vst [vmem:[#allocation2 + $0x8] sm:$0xff] %v741_v18 }
  0x4b PF: > { %v335_v19 = vld [vmem:[%s898_s29 + $0x78] sm:$0xff]  ;;  %v334_v20 = vld [vmem:[%s898_s29 + $0x70] sm:$0xff]  ;;  %v333_v21 = vld [vmem:[%s898_s29 + $0x68] sm:$0xff]  ;;  %p536_p4 = scmp.ne.s32.totalorder %s723_s15, 1 }
  0x4c   : > { %336 = vmatpush.xpose.msra.mxu0 %v335_v19  ;;  %547 = vmatpush.xpose.msra.mxu1 %v335_v19  ;;  %v332_v22 = vld [vmem:[%s898_s29 + $0x60] sm:$0xff]  ;;  %v331_v23 = vld [vmem:[%s898_s29 + $0x58] sm:$0xff]  ;;  %v330_v24 = vld [vmem:[%s898_s29 + $0x50] sm:$0xff] }
  0x4d   : > { %v329_v25 = vld [vmem:[%s898_s29 + $0x48] sm:$0xff]  ;;  %v328_v26 = vld [vmem:[%s898_s29 + $0x40] sm:$0xff]  ;;  %v327_v27 = vld [vmem:[%s898_s29 + $0x38] sm:$0xff] }
  0x4e   : > { %v326_v28 = vld [vmem:[%s898_s29 + $0x30] sm:$0xff]  ;;  %v325_v29 = vld [vmem:[%s898_s29 + $0x28] sm:$0xff]  ;;  %v324_v30 = vld [vmem:[%s898_s29 + $0x20] sm:$0xff] }
  0x4f   : > { %v323_v31 = vld [vmem:[%s898_s29 + $0x18] sm:$0xff]  ;;  %v322_v32 = vld [vmem:[%s898_s29 + $0x10] sm:$0xff]  ;;  %v321_v33 = vld [vmem:[%s898_s29 + $0x8] sm:$0xff] }
  0x50   : > { %337 = vmatpush.xpose.msra.mxu0 %v334_v20  ;;  %548 = vmatpush.xpose.msra.mxu1 %v334_v20  ;;  %v320_v34 = vld [vmem:[%s898_s29] sm:$0xff]  ;;  %v319_v36 = vld [vmem:[%s280_s25 + $0x8] sm:$0xff]  ;;  %v316_v37 = vld [vmem:[#allocation2] sm:$0xff] }
  0x51   : > { %v318_v35 = vld [vmem:[%s280_s25] sm:$0xff]  ;;  %v317_v38 = vld [vmem:[#allocation2 + $0x8] sm:$0xff] }
  0x54   : > { %338 = vmatpush.xpose.msra.mxu0 %v333_v21  ;;  %549 = vmatpush.xpose.msra.mxu1 %v333_v21 }
  0x58   : > { %339 = vmatpush.xpose.msra.mxu0 %v332_v22  ;;  %550 = vmatpush.xpose.msra.mxu1 %v332_v22 }
  0x5c   : > { %340 = vmatpush.xpose.msra.mxu0 %v331_v23  ;;  %551 = vmatpush.xpose.msra.mxu1 %v331_v23 }
  0x60   : > { %341 = vmatpush.xpose.msra.mxu0 %v330_v24  ;;  %552 = vmatpush.xpose.msra.mxu1 %v330_v24 }
  0x64   : > { %342 = vmatpush.xpose.msra.mxu0 %v329_v25  ;;  %553 = vmatpush.xpose.msra.mxu1 %v329_v25 }
  0x68   : > { %343 = vmatpush.xpose.msra.mxu0 %v328_v26  ;;  %554 = vmatpush.xpose.msra.mxu1 %v328_v26 }
  0x6c   : > { %344 = vmatpush.xpose.msra.mxu0 %v327_v27  ;;  %555 = vmatpush.xpose.msra.mxu1 %v327_v27 }
  0x70   : > { %345 = vmatpush.xpose.msra.mxu0 %v326_v28  ;;  %556 = vmatpush.xpose.msra.mxu1 %v326_v28 }
  0x74   : > { %346 = vmatpush.xpose.msra.mxu0 %v325_v29  ;;  %557 = vmatpush.xpose.msra.mxu1 %v325_v29 }
  0x78   : > { %347 = vmatpush.xpose.msra.mxu0 %v324_v30  ;;  %558 = vmatpush.xpose.msra.mxu1 %v324_v30 }
  0x7c   : > { %348 = vmatpush.xpose.msra.mxu0 %v323_v31  ;;  %559 = vmatpush.xpose.msra.mxu1 %v323_v31 }
  0x80   : > { %349 = vmatpush.xpose.msra.mxu0 %v322_v32  ;;  %560 = vmatpush.xpose.msra.mxu1 %v322_v32 }
  0x84   : > { %350 = vmatpush.xpose.msra.mxu0 %v321_v33  ;;  %561 = vmatpush.xpose.msra.mxu1 %v321_v33 }
  0x88   : > { %351 = vmatpush.xpose.msra.mxu0 %v320_v34  ;;  %562 = vmatpush.xpose.msra.mxu1 %v320_v34 }
  0x8b   : > { %352 = vmatmul.f32.vlgmr.msra.gmra.mxu0 %v318_v35  ;;  %355 = vmatmul.f32.vlgmr.msra.gmra.mxu1 %v319_v36 }
 0x108   : > { %v353_v39 = vpop.f32.mrf.mxu0  ;;  %v356_v40 = vpop.f32.mrf.mxu1  ;;  %366 = sbr.rel (%p536_p4) target bundleno = 281 (0x119), region = 112 }
 0x109   : > { %v359_v41 = vadd.f32 %v353_v39, %v316_v37  ;;  %v360_v42 = vadd.f32 %v356_v40, %v317_v38 }
 0x10b   : > { %361 = vst [vmem:[#allocation2] sm:$0xff] %v359_v41 }
 0x10c   : > { %362 = vst [vmem:[#allocation2 + $0x8] sm:$0xff] %v360_v42 }
 0x10d   : > { %v742_v45 = vmov 0.0  }
 0x112   : > { %v367_v43 = vld [vmem:[#allocation2] sm:$0xff] }
 0x113   : > { %v368_v44 = vld [vmem:[#allocation2 + $0x8] sm:$0xff]  ;;  %vm369_vm0 = vcmp.ge.f32.partialorder %v367_v43, 0.5 }
 0x114   : > { %vm370_vm1 = vcmp.ge.f32.partialorder %v368_v44, 0.5  ;;  %v537_v46 = vsel %vm369_vm0, 1.0, %v742_v45 }
 0x115   : > { %v538_v47 = vsel %vm370_vm1, 1.0, %v742_v45 }
 0x116   : > { %v545_v48 = vpack.c.bf16 %v538_v47, %v537_v46 }
 0x118   : > { %546 = vst [vmem:[%s900_s3] sm:$0xff] %v545_v48  }
 0x119 PF: > { %385 = sbr.rel (!%p852_p12) target bundleno = 290 (0x122), region = 116  ;;  %s540_s9 = sshll.u32 (%p852_p12), %s727_s16, 2 }
 0x11a   : > { %s387_s15 = scalar_lea.vmem (%p852_p12), %s968_s2, %s540_s9 }
 0x11f   : > { %v404_v49 = vld [vmem:[%s900_s3] sm:$0xf]  ;;  %v406_v50 = vld [vmem:[%s900_s3 + $0x4] sm:$0xf] }
 0x120   : > { %405 = vst [vmem:[%s387_s15] sm:$0xf] %v404_v49 }
 0x121   : > { %407 = vst [vmem:[%s387_s15 + $0x8] sm:$0xf] %v406_v50 }
 0x122 PF: > { %s12_s19 = sadd.s32 1, %s739_s19   ;;  %s976_s6 = sld [smem:[#allocation6_spill]] }
 0x123   : > { %p9_p5 = scmp.ge.s32.totalorder %s12_s19, 6   ;;  %s977_s7 = sld [smem:[#allocation7_spill]] }
 0x124   : > { %s978_s9 = smov %s703_s10  ;;  %s979_s10 = smov %s850_s5 }
 0x125   : > { %s980_s11 = smov %s711_s12  ;;  %s981_s12 = smov %s847_s4 }
 0x126   : > { %s982_s13 = smov %s719_s14  ;;  %s983_s14 = smov %s833_s27 }
 0x127   : > { %s984_s15 = smov %s731_s17  ;;  %s985_s16 = smov %s735_s18 }
 0x128   : > { %s986_s17 = smov %s976_s6  ;;  %11 = sbr.rel (!%p9_p5) target bundleno = 6 (0x6), region = 196 }
 0x129   : > { %s987_s18 = smov %s977_s7 }

// kernel: stdp_forward.3
= control target key start
LH: loop header
LB: loop body
LE: loop exit
PB: predicated region body
PF: predicated region fallthrough
CT: control target
= control target key end

     0   :  { %s857_s9 = smov 0   ;;  %s859_s10 = smov 0   ;;  %s1065_s0 = inlined_call_operand.vmem [shape: bf16[16,256], index: 0, kind: input, shape index: {}]   ;;  %s1066_s1 = inlined_call_operand.vmem [shape: f32[16,256], index: 1, kind: input, shape index: {}]   ;;  %s1067_s2 = inlined_call_operand.vmem [shape: f32[256,256], index: 2, kind: output, shape index: {}]  }
   0x1   :  { %s861_s11 = smov 0   ;;  %s863_s12 = smov 0  }
   0x2   :  { %s865_s13 = smov 0   ;;  %s867_s14 = smov 0  }
   0x3   :  { %s869_s15 = smov 0   ;;  %s871_s16 = smov 0  }
   0x4   :  { %s873_s17 = smov 0   ;;  %s875_s18 = smov 0  }
   0x5   :  { %s877_s19 = smov 0  }
   0x6 LB: > { %s620_s20 = sadd.s32 4294967295, %s840_s19   ;;  %s21_s21 = sadd.s32 1, %s832_s17  ;;  %s840_s19 = sphi %s877_s19, %s12_s19   ;;  %s836_s18 = sphi %s875_s18, %s1086_s18   ;;  %s832_s17 = sphi %s873_s17, %s1085_s17   ;;  %s828_s16 = sphi %s871_s16, %s1084_s16   ;;  %s824_s15 = sphi %s869_s15, %s1083_s15   ;;  %s820_s14 = sphi %s867_s14, %s1082_s14   ;;  %s816_s13 = sphi %s865_s13, %s1081_s13   ;;  %s812_s12 = sphi %s863_s12, %s1080_s12   ;;  %s808_s11 = sphi %s861_s11, %s1079_s11   ;;  %s804_s10 = sphi %s859_s10, %s1078_s10   ;;  %s800_s9 = sphi %s857_s9, %s1077_s9  }
   0x7   : > { %p22_p0 = scmp.ge.s32.totalorder %s21_s21, 2  ;;  %s24_s22 = sadd.s32 1, %s836_s18 }
   0x8   : > { %s31_s23 = sadd.s32 1, %s820_s14  ;;  %p38_p1 = scmp.ne.s32.totalorder %s820_s14, %s816_s13 }
   0x9   : > { %s1088_s21 = smov (%p22_p0, %s21_s21), 0  ;;  %s1090_s22 = smov (!%p22_p0, %s24_s22), %s836_s18 }
   0xa   : > { %1070 = sst [smem:[#allocation5_spill]] %s1088_s21  ;;  %p39_p2 = scmp.eq.s32.totalorder %s840_s19, 0 }
   0xb   : > { %s54_s24 = ssub.s32 %s832_s17, %s1088_s21  ;;  %p26_p3 = scmp.ge.s32.totalorder %s1090_s22, 2 }
   0xc   : > { %p55_p4 = scmp.eq.s32.totalorder %s54_s24, 0  ;;  %p924_p5 = por %p39_p2, %p38_p1 }
   0xd   : > { %s57_s26 = sadd.s32 1, %s812_s12  ;;  %s1092_s22 = smov (%p26_p3, %s1090_s22), 0 }
   0xe   : > { %1072 = sst [smem:[#allocation6_spill]] %s1092_s22  ;;  %s28_s28 = ssub.s32 %s836_s18, %s1092_s22 }
   0xf   : > { %s932_s27 = scalar_select %p55_p4, %s812_s12, %s57_s26  }
  0x10   : > { %p64_p6 = scmp.ne.s32.totalorder %s812_s12, %s808_s11  ;;  %p29_p7 = scmp.eq.s32.totalorder %s28_s28, 0 }
  0x11   : > { %s82_s29 = sor.u32 %s54_s24, %s28_s28  ;;  %s85_s4 = sadd.s32 1, %s804_s10 }
  0x12   : > { %p938_p8 = por %p64_p6, %p39_p2  ;;  %p83_p9 = scmp.eq.s32.totalorder %s82_s29, 0 }
  0x13   : > { %s943_s3 = scalar_select %p29_p7, %s820_s14, %s31_s23  }
  0x14   : > { %p95_p10 = scmp.ne.s32.totalorder %s804_s10, %s800_s9  ;;  %p96_p11 = scmp.eq.s32.totalorder %s620_s20, 3 }
  0x15   : > { %s949_s5 = scalar_select %p83_p9, %s804_s10, %s85_s4  }
  0x16   : > { %p951_p12 = por %p96_p11, %p95_p10  ;;  %p623_p13 = scmp.ge.s32.totalorder %s840_s19, 4 }
  0x18   : > { %118 = sbr.rel (%p623_p13) target bundleno = 41 (0x29), region = 16 }
  0x1d   : > { %121 = sbr.rel (!%p924_p5) target bundleno = 35 (0x23), region = 20  ;;  %s123_s7 = sand.u32 (%p924_p5), 1, %s820_s14  }
  0x1e   : > { %s625_s8 = sshll.u32 (%p924_p5), %s836_s18, 2  ;;  %s624_s23 = sshll.u32 (%p924_p5), %s123_s7, 3 }
  0x1f   : > { %s127_s28 = scalar_lea.vmem (%p924_p5), %s1065_s0, %s625_s8  ;;  %s125_s20 = scalar_lea.vmem (%p924_p5), [#allocation2], %s624_s23 }
  0x20   : > { %v144_v0 = vld [vmem:[%s127_s28] sm:$0xf] (%p924_p5)  ;;  %v146_v1 = vld [vmem:[%s127_s28 + $0x8] sm:$0xf] (%p924_p5) }
  0x21   : > { %145 = vst [vmem:[%s125_s20] sm:$0xf] (%p924_p5), %v144_v0 }
  0x22   : > { %147 = vst [vmem:[%s125_s20 + $0x4] sm:$0xf] %v146_v1 }
  0x23 PF: > { %175 = sbr.rel (!%p938_p8) target bundleno = 41 (0x29), region = 61  ;;  %s177_s25 = sand.u32 (%p938_p8), 1, %s812_s12  }
  0x24   : > { %s627_s29 = sshll.u32 (%p938_p8), %s832_s17, 3  ;;  %s626_s4 = sshll.u32 (%p938_p8), %s177_s25, 4 }
  0x25   : > { %s181_s21 = scalar_lea.vmem (%p938_p8), %s1066_s1, %s627_s29  ;;  %s179_s8 = scalar_lea.vmem (%p938_p8), [#allocation3], %s626_s4 }
  0x26   : > { %v212_v2 = vld [vmem:[%s181_s21] sm:$0xff] (%p938_p8)  ;;  %v214_v3 = vld [vmem:[%s181_s21 + $0x10] sm:$0xff] (%p938_p8) }
  0x27   : > { %213 = vst [vmem:[%s179_s8] sm:$0xff] (%p938_p8), %v212_v2 }
  0x28   : > { %215 = vst [vmem:[%s179_s8 + $0x8] sm:$0xff] %v214_v3 }
  0x29 PF: > { %p628_p0 = scmp.ge.s32.totalorder %s840_s19, 1  ;;  %p220_p1 = scmp.lt.s32.totalorder %s840_s19, 5 }
  0x2b   : > { %p221_p2 = pnand %p628_p0, %p220_p1 }
  0x2c   : > { %s227_s30 = sand.u32 (!%p221_p2), 1, %s816_s13   ;;  %s234_s23 = sand.u32 (!%p221_p2), 1, %s808_s11  }
  0x2d   : > { %224 = sbr.rel (%p221_p2) target bundleno = 480 (0x1e0), region = 99  ;;  %s629_s24 = sshll.u32 (!%p221_p2), %s227_s30, 3 }
  0x2e   : > { %s630_s22 = sshll.u32 (!%p221_p2), %s234_s23, 4  ;;  %s229_s26 = scalar_lea.vmem (!%p221_p2), [#allocation2], %s629_s24 }
  0x2f   : > { %s236_s21 = scalar_lea.vmem (!%p221_p2), [#allocation3], %s630_s22  ;;  %s255_s11 = sand.u32 (!%p221_p2), 1, %s800_s9  }
  0x30   : > { %s631_s13 = sshll.u32 (!%p221_p2), %s255_s11, 7 }
  0x31   : > { %s991_s28 = scalar_lea.vmem (!%p221_p2), [#allocation4], %s631_s13 }
  0x32   : > { %v656_v4 = vld [vmem:[%s229_s26] sm:$0xff]   ;;  %v263_v6 = vld [vmem:[%s236_s21] sm:$0xff]  ;;  %vm297_vm0 = vcmask 130048   ;;  %s654_s9 = sshll.u32 (%p951_p12), %s828_s16, 5 }
  0x33   : > { %v264_v5 = vld [vmem:[%s236_s21 + $0x8] sm:$0xff]  ;;  %v657_v7 = vunpack.c.l.bf16 %v656_v4  ;;  %v658_v8 = vunpack.c.h.bf16 %v656_v4  ;;  %s436_s20 = sadd.s32 (%p951_p12), %s824_s15, %s654_s9 }
  0x34   : > { %360 = vmatpush.msra.mxu0 %v264_v5  ;;  %659 = vmatpush.msra.mxu1 %v264_v5  ;;  %s651_s25 = sshll.u32 (%p951_p12), %s436_s20, 3 }
  0x35   : > { %660 = vmatpush.msra.mxu2 %v264_v5  ;;  %661 = vmatpush.msra.mxu3 %v264_v5  ;;  %s438_s6 = scalar_lea.vmem (%p951_p12), %s1067_s2, %s651_s25 }
  0x36   : > { %265 = vxpose.xlu0.b32.start [1/2] (short) %v657_v7, 128  ;;  %361 = vmatpush.msra.mxu0 %v263_v6 }
  0x37   : > { %662 = vmatpush.msra.mxu1 %v263_v6  ;;  %663 = vmatpush.msra.mxu2 %v263_v6 }
  0x38   : > { %664 = vmatpush.msra.mxu3 %v263_v6 }
  0x3e   : > { %266 = vxpose.xlu0.b32.end [2/2] (short) %v658_v8, 128 }
  0xda   : > { %v281_v9 = vpop.trf.xlu0 }
  0xdb   : > { %632 = vmatmul.msk.f32.vlgmr.msra.gmra.mxu0 %vm297_vm0, %v281_v9 }
  0xe2   : > { %v282_v10 = vpop.trf.xlu0 }
  0xe3   : > { %633 = vmatmul.msk.f32.gmra.mxu0 %vm297_vm0, %v282_v10 }
  0xea   : > { %v283_v11 = vpop.trf.xlu0 }
  0xeb   : > { %634 = vmatmul.msk.f32.gmra.mxu0 %vm297_vm0, %v283_v11 }
  0xf2   : > { %v284_v12 = vpop.trf.xlu0 }
  0xf3   : > { %635 = vmatmul.msk.f32.gmra.mxu0 %vm297_vm0, %v284_v12 }
  0xfa   : > { %v285_v13 = vpop.trf.xlu0 }
  0xfb   : > { %636 = vmatmul.msk.f32.vlgmr.msra.gmra.mxu1 %vm297_vm0, %v285_v13 }
 0x102   : > { %v286_v14 = vpop.trf.xlu0 }
 0x103   : > { %637 = vmatmul.msk.f32.gmra.mxu1 %vm297_vm0, %v286_v14 }
 0x10a   : > { %v287_v15 = vpop.trf.xlu0 }
 0x10b   : > { %638 = vmatmul.msk.f32.gmra.mxu1 %vm297_vm0, %v287_v15 }
 0x112   : > { %v288_v16 = vpop.trf.xlu0 }
 0x113   : > { %639 = vmatmul.msk.f32.gmra.mxu1 %vm297_vm0, %v288_v16 }
 0x11a   : > { %v289_v17 = vpop.trf.xlu0 }
 0x11b   : > { %640 = vmatmul.msk.f32.vlgmr.msra.gmra.mxu2 %vm297_vm0, %v289_v17 }
 0x122   : > { %v290_v18 = vpop.trf.xlu0 }
 0x123   : > { %641 = vmatmul.msk.f32.gmra.mxu2 %vm297_vm0, %v290_v18 }
 0x12a   : > { %v291_v19 = vpop.trf.xlu0 }
 0x12b   : > { %642 = vmatmul.msk.f32.gmra.mxu2 %vm297_vm0, %v291_v19 }
 0x132   : > { %v292_v20 = vpop.trf.xlu0 }
 0x133   : > { %643 = vmatmul.msk.f32.gmra.mxu2 %vm297_vm0, %v292_v20 }
 0x13a   : > { %v293_v21 = vpop.trf.xlu0 }
 0x13b   : > { %644 = vmatmul.msk.f32.vlgmr.msra.gmra.mxu3 %vm297_vm0, %v293_v21 }
 0x142   : > { %v294_v22 = vpop.trf.xlu0 }
 0x143   : > { %645 = vmatmul.msk.f32.gmra.mxu3 %vm297_vm0, %v294_v22 }
 0x14a   : > { %v295_v23 = vpop.trf.xlu0 }
 0x14b   : > { %646 = vmatmul.msk.f32.gmra.mxu3 %vm297_vm0, %v295_v23 }
 0x152   : > { %v296_v24 = vpop.trf.xlu0 }
 0x153   : > { %647 = vmatmul.msk.f32.gmra.mxu3 %vm297_vm0, %v296_v24 }
 0x158   : > { %v363_v25 = vpop.f32.mrf.mxu0 }
 0x159   : > { %411 = vst [vmem:[%s991_s28] sm:$0xff] %v363_v25 }
 0x160   : > { %v366_v26 = vpop.f32.mrf.mxu0  ;;  %v497_v41 = vld [vmem:[%s991_s28] sm:$0xff] (%p951_p12) }
 0x161   : > { %412 = vst [vmem:[%s991_s28 + $0x8] sm:$0xff] %v366_v26 }
 0x162   : > { %498 = vst [vmem:[%s438_s6] sm:$0xff] (%p951_p12), %v497_v41 }
 0x168   : > { %v369_v27 = vpop.f32.mrf.mxu0  ;;  %v499_v42 = vld [vmem:[%s991_s28 + $0x8] sm:$0xff] (%p951_p12) }
 0x169   : > { %413 = vst [vmem:[%s991_s28 + $0x10] sm:$0xff] %v369_v27 }
 0x16a   : > { %500 = vst [vmem:[%s438_s6 + $0x10] sm:$0xff] (%p951_p12), %v499_v42 }
 0x170   : > { %v372_v28 = vpop.f32.mrf.mxu0  ;;  %v501_v43 = vld [vmem:[%s991_s28 + $0x10] sm:$0xff] (%p951_p12) }
 0x171   : > { %414 = vst [vmem:[%s991_s28 + $0x18] sm:$0xff] %v372_v28 }
 0x172   : > { %502 = vst [vmem:[%s438_s6 + $0x20] sm:$0xff] (%p951_p12), %v501_v43 }
 0x178   : > { %v375_v29 = vpop.f32.mrf.mxu1  ;;  %v503_v44 = vld [vmem:[%s991_s28 + $0x18] sm:$0xff] (%p951_p12) }
 0x179   : > { %415 = vst [vmem:[%s991_s28 + $0x20] sm:$0xff] %v375_v29 }
 0x17a   : > { %504 = vst [vmem:[%s438_s6 + $0x30] sm:$0xff] (%p951_p12), %v503_v44 }
 0x180   : > { %v378_v30 = vpop.f32.mrf.mxu1  ;;  %v505_v45 = vld [vmem:[%s991_s28 + $0x20] sm:$0xff] (%p951_p12) }
 0x181   : > { %416 = vst [vmem:[%s991_s28 + $0x28] sm:$0xff] %v378_v30 }
 0x182   : > { %506 = vst [vmem:[%s438_s6 + $0x40] sm:$0xff] (%p951_p12), %v505_v45 }
 0x188   : > { %v381_v31 = vpop.f32.mrf.mxu1  ;;  %v507_v46 = vld [vmem:[%s991_s28 + $0x28] sm:$0xff] (%p951_p12) }
 0x189   : > { %417 = vst [vmem:[%s991_s28 + $0x30] sm:$0xff] %v381_v31 }
 0x18a   : > { %508 = vst [vmem:[%s438_s6 + $0x50] sm:$0xff] (%p951_p12), %v507_v46 }
 0x190   : > { %v384_v32 = vpop.f32.mrf.mxu1  ;;  %v509_v47 = vld [vmem:[%s991_s28 + $0x30] sm:$0xff] (%p951_p12) }
 0x191   : > { %418 = vst [vmem:[%s991_s28 + $0x38] sm:$0xff] %v384_v32 }
 0x192   : > { %510 = vst [vmem:[%s438_s6 + $0x60] sm:$0xff] (%p951_p12), %v509_v47 }
 0x198   : > { %v511_v48 = vld [vmem:[%s991_s28 + $0x38] sm:$0xff] (%p951_p12) }
 0x199   : > { %512 = vst [vmem:[%s438_s6 + $0x70] sm:$0xff] (%p951_p12), %v511_v48 }
 0x19e   : > { %v387_v33 = vpop.f32.mrf.mxu2 }
 0x19f   : > { %419 = vst [vmem:[%s991_s28 + $0x40] sm:$0xff] %v387_v33 }
 0x1a6   : > { %v390_v34 = vpop.f32.mrf.mxu2  ;;  %v513_v49 = vld [vmem:[%s991_s28 + $0x40] sm:$0xff] (%p951_p12) }
 0x1a7   : > { %420 = vst [vmem:[%s991_s28 + $0x48] sm:$0xff] %v390_v34 }
 0x1a8   : > { %514 = vst [vmem:[%s438_s6 + $0x80] sm:$0xff] (%p951_p12), %v513_v49 }
 0x1ae   : > { %v393_v35 = vpop.f32.mrf.mxu2  ;;  %v515_v50 = vld [vmem:[%s991_s28 + $0x48] sm:$0xff] (%p951_p12) }
 0x1af   : > { %421 = vst [vmem:[%s991_s28 + $0x50] sm:$0xff] %v393_v35 }
 0x1b0   : > { %516 = vst [vmem:[%s438_s6 + $0x90] sm:$0xff] (%p951_p12), %v515_v50 }
 0x1b6   : > { %v396_v36 = vpop.f32.mrf.mxu2  ;;  %v517_v51 = vld [vmem:[%s991_s28 + $0x50] sm:$0xff] (%p951_p12) }
 0x1b7   : > { %422 = vst [vmem:[%s991_s28 + $0x58] sm:$0xff] %v396_v36 }
 0x1b8   : > { %518 = vst [vmem:[%s438_s6 + $0xa0] sm:$0xff] (%p951_p12), %v517_v51 }
 0x1be   : > { %v399_v37 = vpop.f32.mrf.mxu3  ;;  %v519_v52 = vld [vmem:[%s991_s28 + $0x58] sm:$0xff] (%p951_p12) }
 0x1bf   : > { %423 = vst [vmem:[%s991_s28 + $0x60] sm:$0xff] %v399_v37 }
 0x1c0   : > { %520 = vst [vmem:[%s438_s6 + $0xb0] sm:$0xff] (%p951_p12), %v519_v52 }
 0x1c6   : > { %v402_v38 = vpop.f32.mrf.mxu3  ;;  %v521_v53 = vld [vmem:[%s991_s28 + $0x60] sm:$0xff] (%p951_p12) }
 0x1c7   : > { %424 = vst [vmem:[%s991_s28 + $0x68] sm:$0xff] %v402_v38 }
 0x1c8   : > { %522 = vst [vmem:[%s438_s6 + $0xc0] sm:$0xff] (%p951_p12), %v521_v53 }
 0x1ce   : > { %v405_v39 = vpop.f32.mrf.mxu3  ;;  %v523_v54 = vld [vmem:[%s991_s28 + $0x68] sm:$0xff] (%p951_p12) }
 0x1cf   : > { %425 = vst [vmem:[%s991_s28 + $0x70] sm:$0xff] %v405_v39 }
 0x1d0   : > { %524 = vst [vmem:[%s438_s6 + $0xd0] sm:$0xff] (%p951_p12), %v523_v54 }
 0x1d3   : > { %433 = sbr.rel (!%p951_p12) target bundleno = 480 (0x1e0), region = 111 }
 0x1d6   : > { %v408_v40 = vpop.f32.mrf.mxu3  ;;  %v525_v55 = vld [vmem:[%s991_s28 + $0x70] sm:$0xff] (%p951_p12) }
 0x1d7   : > { %426 = vst [vmem:[%s991_s28 + $0x78] sm:$0xff] %v408_v40 }
 0x1d8   : > { %526 = vst [vmem:[%s438_s6 + $0xe0] sm:$0xff] %v525_v55 }
 0x1de   : > { %v527_v56 = vld [vmem:[%s991_s28 + $0x78] sm:$0xff] }
 0x1df   : > { %528 = vst [vmem:[%s438_s6 + $0xf0] sm:$0xff] %v527_v56 }
 0x1e0 PF: > { %s12_s19 = sadd.s32 1, %s840_s19   ;;  %s1075_s7 = sld [smem:[#allocation5_spill]] }
 0x1e1   : > { %p9_p3 = scmp.ge.s32.totalorder %s12_s19, 6   ;;  %s1076_s8 = sld [smem:[#allocation6_spill]] }
 0x1e2   : > { %s1077_s9 = smov %s804_s10  ;;  %s1078_s10 = smov %s949_s5 }
 0x1e3   : > { %s1079_s11 = smov %s812_s12  ;;  %s1080_s12 = smov %s932_s27 }
 0x1e4   : > { %s1081_s13 = smov %s820_s14  ;;  %s1082_s14 = smov %s943_s3 }
 0x1e5   : > { %s1083_s15 = smov %s832_s17  ;;  %s1084_s16 = smov %s836_s18 }
 0x1e6   : > { %s1085_s17 = smov %s1075_s7  ;;  %11 = sbr.rel (!%p9_p3) target bundleno = 6 (0x6), region = 188 }
 0x1e7   : > { %s1086_s18 = smov %s1076_s8 }

</bundles_post_ra>
